<compile_context>
chip_gen: v7x
topology: tpu7x:2x2x1
jax: 0.10.0
libtpu: 0.0.40
codegen_flags: <defaults>
</compile_context>

<pallas_src>
import math

import jax
import jax.numpy as jnp
from jax.experimental import pallas as pl
from jax.experimental.pallas import tpu as pltpu


def _get_pad(size: int, multiple: int):
    new_size = math.ceil(size / multiple) * multiple
    pad_size = new_size - size
    pad_left = pad_size // 2
    pad_right = pad_size - pad_left
    return pad_left, pad_right


def _divisors(n: int):
    return [d for d in range(1, n + 1) if n % d == 0]


def center_padding(x: jax.Array, multiple: int) -> jax.Array:
    """Pallas implementation of CenterPadding.forward for a 4-D NCHW input."""
    if x.ndim != 4:
        raise ValueError("center_padding expects a 4-D NCHW input")
    N, C, H, W = x.shape
    pad_top, pad_bottom = _get_pad(H, multiple)
    pad_left, pad_right = _get_pad(W, multiple)
    if pad_top == pad_bottom == pad_left == pad_right == 0:
        return x  # F.pad with all-zero pads is the identity

    H_out = H + pad_top + pad_bottom
    W_out = W + pad_left + pad_right
    dtype = x.dtype
    itemsize = jnp.dtype(dtype).itemsize

    P = N * C
    xf = x.reshape(P, H, W)  # free reshape (merging leading dims)

    # ---------------- tile selection ----------------
    pack = 8 * max(1, 4 // itemsize)      # sublane packing: 8 f32, 16 bf16, 32 int8
    TARGET_BAND_BYTES = 2 << 20           # ~2 MiB bands already reach HBM roofline
    MIN_STEPS = 8                         # target >= 8 grid steps for pipelining / 2 TCs

    rows_budget = max(pack, (TARGET_BAND_BYTES // max(1, W_out * itemsize)) // pack * pack)
    rows_steps = max(pack, (H_out // MIN_STEPS) // pack * pack)
    rows_fit_h = (H // pack) * pack       # largest pack-multiple that is <= H
    th = min(rows_budget, rows_steps, rows_fit_h) if rows_fit_h else 0
    nh = -(-H_out // th) if th else 1
    banded = bool(th) and th >= pack and nh >= 2

    # Statically resolved boundary bands.  Band h covers output rows
    # [h*th, h*th+th); output row R holds input row R - pad_top when
    # pad_top <= R < pad_top + H, else zero.  "Interior" bands need no
    # zero rows and map to a contiguous in-range input window.
    specials = []
    if banded:
        specials = [h for h in range(nh) if not (0 <= h * th - pad_top <= H - th)]
        if len(specials) > 8:             # pathological (huge `multiple`) -> keep it simple
            banded = False
    if not banded:
        th = H_out
        nh = 1
        specials = []

    plane_in_b = H * W * itemsize
    band_out_b = th * W_out * itemsize
    pb = 1
    for d in _divisors(P):                # ascending; keep the largest valid divisor
        if d * plane_in_b > (4 << 20) or d * band_out_b > (2 << 20):
            continue
        steps = (P // d) * nh
        if steps >= min(MIN_STEPS, P * nh):
            pb = d
    np_ = P // pb

    def _lane_pad(v):
        # Zero-pad the last (lane) dim in registers so every row store is
        # full-width and lane-dense.
        if pad_left == 0 and pad_right == 0:
            return v
        parts = []
        if pad_left:
            parts.append(jnp.zeros(v.shape[:-1] + (pad_left,), v.dtype))
        parts.append(v)
        if pad_right:
            parts.append(jnp.zeros(v.shape[:-1] + (pad_right,), v.dtype))
        return jnp.concatenate(parts, axis=-1)

    if banded:
        def kernel(x_ref, o_ref):
            h = pl.program_id(1)

            def emit_special(h_idx):
                lo = min(max(0, pad_top - h_idx * th), th)        # first data row in band
                hi = max(min(th, pad_top + H - h_idx * th), 0)    # one past last data row

                @pl.when(h == h_idx)
                def _():
                    if hi <= lo:                                   # band is all padding
                        o_ref[...] = jnp.zeros((pb, th, W_out), o_ref.dtype)
                    else:
                        if lo > 0:
                            o_ref[:, :lo, :] = jnp.zeros((pb, lo, W_out), o_ref.dtype)
                        if hi < th:
                            o_ref[:, hi:, :] = jnp.zeros((pb, th - hi, W_out), o_ref.dtype)
                        in_lo = h_idx * th + lo - pad_top
                        in_hi = h_idx * th + hi - pad_top
                        o_ref[:, lo:hi, :] = _lane_pad(x_ref[:, in_lo:in_hi, :])

            for h_idx in specials:
                emit_special(h_idx)

            if len(specials) < nh:        # at least one interior band exists
                def interior():
                    src0 = jnp.clip(h * th - pad_top, 0, H - th)
                    band = x_ref[:, pl.ds(src0, th), :]
                    o_ref[...] = _lane_pad(band)

                pred = None
                for s in specials:
                    cond = h != s
                    pred = cond if pred is None else (pred & cond)
                if pred is None:
                    interior()
                else:
                    pl.when(pred)(interior)

        grid = (np_, nh)
        in_specs = [pl.BlockSpec((pb, H, W), lambda p, h: (p, 0, 0))]
        out_specs = pl.BlockSpec((pb, th, W_out), lambda p, h: (p, h, 0))
        dims = ("parallel", "parallel")
    else:
        # Whole-plane fallback (tiny H or pathological pad sizes).
        def kernel(x_ref, o_ref):
            if pad_top:
                o_ref[:, :pad_top, :] = jnp.zeros((pb, pad_top, W_out), o_ref.dtype)
            if pad_bottom:
                o_ref[:, pad_top + H:, :] = jnp.zeros((pb, pad_bottom, W_out), o_ref.dtype)
            o_ref[:, pad_top:pad_top + H, :] = _lane_pad(x_ref[...])

        grid = (np_,)
        in_specs = [pl.BlockSpec((pb, H, W), lambda p: (p, 0, 0))]
        out_specs = pl.BlockSpec((pb, H_out, W_out), lambda p: (p, 0, 0))
        dims = ("parallel",)

    # VMEM: double-buffered input plane block + output band block, clamped to
    # the device's capacity (v7x has only 64 MiB per TensorCore).
    in_block_b = pb * plane_in_b
    out_block_b = pb * th * W_out * itemsize
    needed = 2 * (in_block_b + out_block_b) + (4 << 20)
    try:
        cap = int(getattr(pltpu.get_tpu_info(), "vmem_capacity_bytes", 64 << 20))
    except Exception:  # conservative default if the query is unavailable
        cap = 64 << 20
    vmem_limit = int(min(max(needed, 32 << 20), max(cap - (8 << 20), 16 << 20)))

    bytes_accessed = P * (H * W + H_out * W_out) * itemsize

    out = pl.pallas_call(
        kernel,
        out_shape=jax.ShapeDtypeStruct((P, H_out, W_out), dtype),
        grid=grid,
        in_specs=in_specs,
        out_specs=out_specs,
        compiler_params=pltpu.CompilerParams(
            dimension_semantics=dims,
            vmem_limit_bytes=vmem_limit,
        ),
        cost_estimate=pl.CostEstimate(
            flops=0, transcendentals=0, bytes_accessed=bytes_accessed),
    )(xf)
    return out.reshape(N, C, H_out, W_out)


if __name__ == "__main__":
    key = jax.random.PRNGKey(0)
    N, C, H, W = 2, 4, 16, 16
    multiple = 7  # 16 -> 21: asymmetric pad (2 top/left, 3 bottom/right)

    x = jax.random.normal(key, (N, C, H, W), dtype=jnp.float32)

    out = jax.block_until_ready(center_padding(x, multiple))

    # Pure-JAX reference (mirrors torch.nn.functional.pad with constant zeros).
    pt, pbot = _get_pad(H, multiple)
    plft, prgt = _get_pad(W, multiple)
    ref = jnp.pad(x, ((0, 0), (0, 0), (pt, pbot), (plft, prgt)))

    assert out.shape == ref.shape, (out.shape, ref.shape)
    assert out.dtype == x.dtype
    assert jnp.allclose(out, ref), "mismatch vs reference"

    print("KERNEL_OK")
</pallas_src>

<mosaic_0001>
module attributes {stable_mosaic.version = 11 : i64} {
  func.func @kernel(%arg0: i32, %arg1: i32, %arg2: memref<2x16x16xf32, #tpu.memory_space<vmem>>, %arg3: memref<2x8x21xf32, #tpu.memory_space<vmem>>) attributes {dimension_semantics = [#tpu.dimension_semantics<parallel>, #tpu.dimension_semantics<parallel>], iteration_bounds = array<i64: 4, 3>, scalar_prefetch = 0 : i64, scratch_operands = 0 : i64, tpu.core_type = #tpu.core_type<tc>, window_params = [{transform_indices = @transform_0, window_bounds = array<i64: 2, 16, 16>}, {transform_indices = @transform_1, window_bounds = array<i64: 2, 8, 21>}]} {
    %c0_i32 = arith.constant 0 : i32
    %0 = arith.cmpi eq, %arg1, %c0_i32 : i32
    %1 = arith.extui %0 : i1 to i32
    %c0_i32_0 = arith.constant 0 : i32
    %2 = arith.cmpi ne, %1, %c0_i32_0 : i32
    scf.if %2 {
      %cst = arith.constant 0.000000e+00 : f32
      %11 = vector.broadcast %cst : f32 to vector<2x2x21xf32>
      %c0 = arith.constant 0 : index
      %c0_5 = arith.constant 0 : index
      %c0_6 = arith.constant 0 : index
      %12 = vector.load %arg3[%c0, %c0_5, %c0_6] : memref<2x8x21xf32, #tpu.memory_space<vmem>>, vector<2x2x21xf32>
      tpu.vector_store %arg3[%c0, %c0_5, %c0_6], %11 {strides = array<i32>} : memref<2x8x21xf32, #tpu.memory_space<vmem>>, vector<2x2x21xf32>,
      %c0_7 = arith.constant 0 : index
      %c0_8 = arith.constant 0 : index
      %c0_9 = arith.constant 0 : index
      %13 = vector.load %arg2[%c0_7, %c0_8, %c0_9] : memref<2x16x16xf32, #tpu.memory_space<vmem>>, vector<2x6x16xf32>
      %cst_10 = arith.constant 0.000000e+00 : f32
      %14 = vector.broadcast %cst_10 : f32 to vector<2x6x2xf32>
      %cst_11 = arith.constant 0.000000e+00 : f32
      %15 = vector.broadcast %cst_11 : f32 to vector<2x6x3xf32>
      %16 = tpu.concatenate %14, %13, %15 in 2 : vector<2x6x2xf32>, vector<2x6x16xf32>, vector<2x6x3xf32> -> vector<2x6x21xf32>
      %c0_12 = arith.constant 0 : index
      %c2 = arith.constant 2 : index
      %c0_13 = arith.constant 0 : index
      %17 = vector.load %arg3[%c0_12, %c2, %c0_13] : memref<2x8x21xf32, #tpu.memory_space<vmem>>, vector<2x6x21xf32>
      tpu.vector_store %arg3[%c0_12, %c2, %c0_13], %16 {strides = array<i32>} : memref<2x8x21xf32, #tpu.memory_space<vmem>>, vector<2x6x21xf32>,
    } else {
    }
    %c2_i32 = arith.constant 2 : i32
    %3 = arith.cmpi eq, %arg1, %c2_i32 : i32
    %4 = arith.extui %3 : i1 to i32
    %c0_i32_1 = arith.constant 0 : i32
    %5 = arith.cmpi ne, %4, %c0_i32_1 : i32
    scf.if %5 {
      %cst = arith.constant 0.000000e+00 : f32
      %11 = vector.broadcast %cst : f32 to vector<2x6x21xf32>
      %c0 = arith.constant 0 : index
      %c2 = arith.constant 2 : index
      %c0_5 = arith.constant 0 : index
      %12 = vector.load %arg3[%c0, %c2, %c0_5] : memref<2x8x21xf32, #tpu.memory_space<vmem>>, vector<2x6x21xf32>
      tpu.vector_store %arg3[%c0, %c2, %c0_5], %11 {strides = array<i32>} : memref<2x8x21xf32, #tpu.memory_space<vmem>>, vector<2x6x21xf32>,
      %c0_6 = arith.constant 0 : index
      %c14 = arith.constant 14 : index
      %c0_7 = arith.constant 0 : index
      %13 = vector.load %arg2[%c0_6, %c14, %c0_7] : memref<2x16x16xf32, #tpu.memory_space<vmem>>, vector<2x2x16xf32>
      %cst_8 = arith.constant 0.000000e+00 : f32
      %14 = vector.broadcast %cst_8 : f32 to vector<2x2x2xf32>
      %cst_9 = arith.constant 0.000000e+00 : f32
      %15 = vector.broadcast %cst_9 : f32 to vector<2x2x3xf32>
      %16 = tpu.concatenate %14, %13, %15 in 2 : vector<2x2x2xf32>, vector<2x2x16xf32>, vector<2x2x3xf32> -> vector<2x2x21xf32>
      %c0_10 = arith.constant 0 : index
      %c0_11 = arith.constant 0 : index
      %c0_12 = arith.constant 0 : index
      %17 = vector.load %arg3[%c0_10, %c0_11, %c0_12] : memref<2x8x21xf32, #tpu.memory_space<vmem>>, vector<2x2x21xf32>
      tpu.vector_store %arg3[%c0_10, %c0_11, %c0_12], %16 {strides = array<i32>} : memref<2x8x21xf32, #tpu.memory_space<vmem>>, vector<2x2x21xf32>,
    } else {
    }
    %c0_i32_2 = arith.constant 0 : i32
    %6 = arith.cmpi ne, %arg1, %c0_i32_2 : i32
    %c2_i32_3 = arith.constant 2 : i32
    %7 = arith.cmpi ne, %arg1, %c2_i32_3 : i32
    %8 = arith.andi %6, %7 : i1
    %9 = arith.extui %8 : i1 to i32
    %c0_i32_4 = arith.constant 0 : i32
    %10 = arith.cmpi ne, %9, %c0_i32_4 : i32
    scf.if %10 {
      %c8_i32 = arith.constant 8 : i32
      %11 = arith.muli %arg1, %c8_i32 : i32
      %c2_i32_5 = arith.constant 2 : i32
      %12 = arith.subi %11, %c2_i32_5 : i32
      %c0_i32_6 = arith.constant 0 : i32
      %c8_i32_7 = arith.constant 8 : i32
      %13 = arith.maxsi %c0_i32_6, %12 : i32
      %14 = arith.minsi %c8_i32_7, %13 : i32
      %c0 = arith.constant 0 : index
      %15 = arith.index_cast %14 : i32 to index
      %c0_8 = arith.constant 0 : index
      %16 = vector.load %arg2[%c0, %15, %c0_8] : memref<2x16x16xf32, #tpu.memory_space<vmem>>, vector<2x8x16xf32>
      %cst = arith.constant 0.000000e+00 : f32
      %17 = vector.broadcast %cst : f32 to vector<2x8x2xf32>
      %cst_9 = arith.constant 0.000000e+00 : f32
      %18 = vector.broadcast %cst_9 : f32 to vector<2x8x3xf32>
      %19 = tpu.concatenate %17, %16, %18 in 2 : vector<2x8x2xf32>, vector<2x8x16xf32>, vector<2x8x3xf32> -> vector<2x8x21xf32>
      %c0_10 = arith.constant 0 : index
      %c0_11 = arith.constant 0 : index
      %c0_12 = arith.constant 0 : index
      %20 = vector.load %arg3[%c0_10, %c0_11, %c0_12] : memref<2x8x21xf32, #tpu.memory_space<vmem>>, vector<2x8x21xf32>
      tpu.vector_store %arg3[%c0_10, %c0_11, %c0_12], %19 {strides = array<i32>} : memref<2x8x21xf32, #tpu.memory_space<vmem>>, vector<2x8x21xf32>,
    } else {
    }
    return
  }
  func.func @transform_0(%arg0: i32, %arg1: i32) -> (i32, i32, i32) {
    %c0_i32 = arith.constant 0 : i32
    %c0_i32_0 = arith.constant 0 : i32
    %c0_i32_1 = arith.constant 0 : i32
    return %arg0, %c0_i32, %c0_i32_0 : i32, i32, i32
  }
  func.func @transform_1(%arg0: i32, %arg1: i32) -> (i32, i32, i32) {
    %c0_i32 = arith.constant 0 : i32
    %c0_i32_0 = arith.constant 0 : i32
    return %arg0, %arg1, %c0_i32 : i32, i32, i32
  }
}

</mosaic_0001>

<bundles_post_ra>
// kernel: tpu_custom_call.1
= control target key start
LH: loop header
LB: loop body
LE: loop exit
PB: predicated region body
PF: predicated region fallthrough
CT: control target
= control target key end

     0   :  { %6 = vsyncpa [#allocation3], 0  ;;  %s822_s0 = inlined_call_operand.hbm [shape: f32[8,16,16], index: 0, kind: input, shape index: {}]   ;;  %s823_s1 = inlined_call_operand.vmem [shape: f32[8,21,21], index: 1, kind: output, shape index: {}]  }
   0x1   :  { %8 = vsyncpa [#allocation3 + $0x1], 0  ;;  %s613_s6 = smov 0   ;;  %s615_s7 = smov 0  }
   0x2   :  { %s617_s8 = smov 0   ;;  %s619_s9 = smov 0  }
   0x3   :  { %s621_s10 = smov 0   ;;  %s623_s11 = smov 0  }
   0x4   :  { %s625_s12 = smov 0   ;;  %s627_s13 = smov 0  }
   0x5   :  { %s629_s14 = smov 0   ;;  %s631_s15 = smov 0  }
   0x6 LB: > { %s356_s16 = sadd.s32 4294967295, %s593_s15   ;;  %s23_s17 = sadd.s32 1, %s585_s13  ;;  %s593_s15 = sphi %s631_s15, %s14_s15   ;;  %s589_s14 = sphi %s629_s14, %s838_s14   ;;  %s585_s13 = sphi %s627_s13, %s837_s13   ;;  %s581_s12 = sphi %s625_s12, %s836_s12   ;;  %s577_s11 = sphi %s623_s11, %s835_s11   ;;  %s573_s10 = sphi %s621_s10, %s834_s10   ;;  %s569_s9 = sphi %s619_s9, %s833_s9   ;;  %s565_s8 = sphi %s617_s8, %s832_s8   ;;  %s561_s7 = sphi %s615_s7, %s831_s7   ;;  %s557_s6 = sphi %s613_s6, %s830_s6  }
   0x7   : > { %p24_p0 = scmp.ge.s32.totalorder %s23_s17, 3  ;;  %s26_s18 = sadd.s32 1, %s589_s14 }
   0x8   : > { %s33_s19 = sadd.s32 1, %s573_s10  ;;  %p40_p1 = scmp.ne.s32.totalorder %s573_s10, %s569_s9 }
   0x9   : > { %s840_s17 = smov (%p24_p0, %s23_s17), 0  ;;  %s842_s18 = smov (!%p24_p0, %s26_s18), %s589_s14 }
   0xa   : > { %p41_p2 = scmp.eq.s32.totalorder %s593_s15, 0  ;;  %p46_p3 = scmp.ne.s32.totalorder %s569_s9, %s565_s8 }
   0xb   : > { %p28_p4 = scmp.ge.s32.totalorder %s842_s18, 4  ;;  %p47_p5 = scmp.eq.s32.totalorder %s356_s16, 0 }
   0xc   : > { %p672_p6 = por %p41_p2, %p40_p1  ;;  %s57_s21 = ssub.s32 %s585_s13, %s840_s17 }
   0xd   : > { %s844_s18 = smov (%p28_p4, %s842_s18), 0  ;;  %p680_p7 = por %p47_p5, %p46_p3 }
   0xe   : > { %s61_s23 = sadd.s32 1, %s561_s7  ;;  %s30_s24 = ssub.s32 %s589_s14, %s844_s18 }
   0xf   : > { %p71_p8 = scmp.ne.s32.totalorder %s561_s7, %s557_s6  ;;  %p31_p9 = scmp.eq.s32.totalorder %s30_s24, 0 }
  0x10   : > { %s58_s25 = sor.u32 %s57_s21, %s30_s24  ;;  %p72_p11 = scmp.eq.s32.totalorder %s356_s16, 11 }
  0x11   : > { %p59_p10 = scmp.eq.s32.totalorder %s58_s25, 0  ;;  %p393_p13 = scmp.lt.s32.totalorder %s593_s15, 12 }
  0x12   : > { %s690_s26 = scalar_select %p31_p9, %s573_s10, %s33_s19  }
  0x13   : > { %s693_s27 = scalar_select %p59_p10, %s561_s7, %s61_s23  }
  0x14   : > { %p695_p12 = por %p72_p11, %p71_p8  ;;  %s98_s29 = sand.u32 1, %s573_s10  }
  0x15   : > { %s360_s30 = sshll.u32 %s98_s29, 5  ;;  %s383_s2 = sshll.u32 %s589_s14, 9 }
  0x16   : > { %s826_s28 = scalar_select %p695_p12, 1, 0 }
  0x17   : > { %s705_s5 = scalar_lea.hbm %s822_s0, %s383_s2  ;;  %s102_s8 = scalar_lea.vmem [#allocation2], %s360_s30 }
  0x18   : > { %s110_s16 = sshll.u32 %s102_s8, 4  ;;  %p711_p0 = pnand %p393_p13, %p672_p6  ;;  %s707_s16 = int_to_ptr.vmem [resolvable:$true] %s110_s16 }
  0x19   : > { %s716_s21 = scalar_lea.sflag [#allocation3], %s98_s29  ;;  %s481_s23 = scalar_lea.hbm %s705_s5, 512 }
  0x1a   : > { %p482_p2 = scmp.ne.s32.totalorder %s705_s5, %s481_s23  ;;  %p483_p3 = pneg %p711_p0 }
  0x1b   : > { %s486_s20 = scalar_lea.hbm %s822_s0, 2048  ;;  %p487_p6 = scmp.lt.u32.totalorder %s705_s5, %s822_s0 }
  0x1c   : > { %p484_p4 = pnand %p483_p3, %p482_p2  ;;  %p488_p8 = scmp.lt.u32.totalorder %s486_s20, %s481_s23 }
  0x1d   : > { %p490_p10 = scmp.lt.u32.totalorder %s481_s23, %s705_s5 }
  0x1e   : > { %p485_p5 = pneg %p484_p4  ;;  %p489_p9 = por %p488_p8, %p487_p6 }
  0x20   : > { %p491_p11 = por %p490_p10, %p489_p9 }
  0x22   : > { %p492_p13 = pnand %p491_p11, %p485_p5 }
  0x24   : > { %495 = shalt.err (!%p492_p13)
}
  0x25   : > { %s496_s29 = scalar_lea.vmem %s707_s16, 512  ;;  %s595_s3 = smov [#allocation2]  }
  0x26   : > { %p497_p2 = scmp.ne.s32.totalorder %s707_s16, %s496_s29  ;;  %s501_s4 = sshll.u32 %s595_s3, 4  ;;  %s502_s4 = int_to_ptr.vmem [resolvable:$false] %s501_s4 }
  0x27   : > { %s503_s8 = scalar_lea.vmem %s502_s4, 1024  ;;  %p504_p12 = scmp.lt.s32.totalorder %s707_s16, %s502_s4 }
  0x28   : > { %p499_p4 = pnand %p497_p2, %p483_p3  ;;  %p505_p6 = scmp.lt.s32.totalorder %s503_s8, %s496_s29 }
  0x2a   : > { %p500_p1 = pneg %p499_p4  ;;  %p506_p8 = por %p505_p6, %p504_p12 }
  0x2c   : > { %p507_p9 = pnand %p506_p8, %p500_p1 }
  0x2e   : > { %510 = shalt.err (!%p507_p9)
}
  0x2f   : > { %s596_s23 = smov 128   ;;  %s597_s24 = smov 8  }
  0x30   : > { %392 = dma.hbm_to_vmem [thread:$0]  (!%p711_p0), %s705_s5, 512, %s707_s16, %s716_s21, %s596_s23, %s596_s23, %s597_s24  }
  0x31   : > { %p118_p3 = scmp.lt.s32.totalorder %s593_s15, 13  ;;  %p828_p5 = scmp.ge.s32.totalorder %s593_s15, 1 }
  0x33   : > { %p119_p10 = pnand %p828_p5, %p118_p3 }
  0x34   : > { %s124_s25 = sand.u32 (!%p119_p10), 1, %s569_s9  }
  0x35   : > { %122 = sbr.rel (%p119_p10) target bundleno = 453 (0x1c5), region = 24  ;;  %s365_s20 = sshll.u32 (!%p119_p10), %s124_s25, 5 }
  0x36   : > { %s125_s30 = scalar_lea.sflag (!%p119_p10), [#allocation3], %s124_s25  ;;  %s748_s2 = scalar_lea.vmem (!%p119_p10), [#allocation2], %s365_s20 }
  0x3c   : > { %552 = dma.done.wait (%p680_p7), %s125_s30, 512  }
  0x3d   : > { %554 = vsyncadd (%p680_p7), %s125_s30, 4294966784  ;;  %s143_s29 = sand.u32 1, %s557_s6   ;;  %p367_p12 = scmp.ne.s32.totalorder %s577_s11, 0 }
  0x3e   : > { %s366_s19 = sshll.u32 %s143_s29, 4  ;;  %v155_v0 = vld [vmem:[%s748_s2] sm:$0x3f] (!%p367_p12)  ;;  %s598_s16 = smov (!%p367_p12), 2   ;;  %vm152_vm0 = vcmask (!%p367_p12), 164864   ;;  %v599_v2 = vmov (!%p367_p12), 0.0  }
  0x3f   : > { %s755_s5 = scalar_lea.vmem [#allocation4], %s366_s19  ;;  %151 = sbr.rel (%p367_p12) target bundleno = 185 (0xb9), region = 32  ;;  %159 = vrot.lane.b32.xlu0 (!%p367_p12), %v155_v0, %s598_s16  ;;  %v156_v1 = vld [vmem:[%s748_s2 + $0x10] sm:$0x3f] (!%p367_p12)  ;;  %vm165_vm1 = vcmask (!%p367_p12), 15360   ;;  %vm168_vm2 = vcmask (!%p367_p12), 146432  }
  0x40   : > { %153 = vst.msk [vmem:[%s755_s5] sm:$0x3] (!%p367_p12), %vm152_vm0, %v599_v2  ;;  %154 = vst.msk [vmem:[%s755_s5 + $0x8] sm:$0x3] (!%p367_p12), %vm152_vm0, %v599_v2  ;;  %vm171_vm3 = vcmask (!%p367_p12), 168960  }
  0x43   : > { %161 = vrot.lane.b32.xlu0 (!%p367_p12), %v156_v1, %s598_s16 }
  0xb1   : > { %v160_v3 = vpop.permute.xlu0 %159 }
  0xb2   : > { %v166_v4 = vsel %vm165_vm1, 0.0, %v160_v3 }
  0xb3   : > { %v169_v5 = vsel %vm168_vm2, %v166_v4, 0.0 }
  0xb4   : > { %172 = vst.msk [vmem:[%s755_s5 + $0x2] sm:$0x3f] %vm171_vm3, %v169_v5 }
  0xb5   : > { %v162_v6 = vpop.permute.xlu0 %161 }
  0xb6   : > { %v167_v7 = vsel %vm165_vm1, 0.0, %v162_v6 }
  0xb7   : > { %v170_v8 = vsel %vm168_vm2, %v167_v7, 0.0 }
  0xb8   : > { %173 = vst.msk [vmem:[%s755_s5 + $0xa] sm:$0x3f] %vm171_vm3, %v170_v8 }
  0xb9 PF: > { %p368_p7 = scmp.ne.s32.totalorder %s577_s11, 2 }
  0xba   : > { %v181_v9 = vld [vmem:[%s748_s2 + $0xe] sm:$0x3] (!%p368_p7)  ;;  %s600_s6 = smov (!%p368_p7), 2   ;;  %vm178_vm4 = vcmask (!%p368_p7), 168960   ;;  %v182_v10 = vld [vmem:[%s748_s2 + $0x1e] sm:$0x3] (!%p368_p7) }
  0xbb   : > { %177 = sbr.rel (%p368_p7) target bundleno = 309 (0x135), region = 36  ;;  %185 = vrot.lane.b32.xlu0 (!%p368_p7), %v181_v9, %s600_s6  ;;  %v601_v11 = vmov (!%p368_p7), 0.0   ;;  %vm191_vm5 = vcmask (!%p368_p7), 15360   ;;  %vm194_vm6 = vcmask (!%p368_p7), 146432   ;;  %vm197_vm7 = vcmask (!%p368_p7), 164864  }
  0xbc   : > { %179 = vst.msk [vmem:[%s755_s5 + $0x2] sm:$0x3f] (!%p368_p7), %vm178_vm4, %v601_v11  ;;  %180 = vst.msk [vmem:[%s755_s5 + $0xa] sm:$0x3f] (!%p368_p7), %vm178_vm4, %v601_v11 }
  0xbf   : > { %187 = vrot.lane.b32.xlu0 (!%p368_p7), %v182_v10, %s600_s6 }
 0x12d   : > { %v186_v12 = vpop.permute.xlu0 %185 }
 0x12e   : > { %v192_v13 = vsel %vm191_vm5, 0.0, %v186_v12 }
 0x12f   : > { %v195_v14 = vsel %vm194_vm6, %v192_v13, 0.0 }
 0x130   : > { %198 = vst.msk [vmem:[%s755_s5] sm:$0x3] %vm197_vm7, %v195_v14 }
 0x131   : > { %v188_v15 = vpop.permute.xlu0 %187 }
 0x132   : > { %v193_v16 = vsel %vm191_vm5, 0.0, %v188_v15 }
 0x133   : > { %v196_v17 = vsel %vm194_vm6, %v193_v16, 0.0 }
 0x134   : > { %199 = vst.msk [vmem:[%s755_s5 + $0x8] sm:$0x3] %vm197_vm7, %v196_v17 }
 0x135 PF: > { %p202_p0 = pnand %p368_p7, %p367_p12 }
 0x136   : > { %s369_s22 = sshll.u32 (!%p202_p0), %s577_s11, 3  ;;  %s602_s4 = smov (!%p202_p0), 2   ;;  %vm223_vm8 = vcmask (!%p202_p0), 15360   ;;  %vm226_vm9 = vcmask (!%p202_p0), 146432   ;;  %vm229_vm10 = vcmask (!%p202_p0), 171008  }
 0x137   : > { %205 = sbr.rel (%p202_p0) target bundleno = 444 (0x1bc), region = 40  ;;  %s370_s21 = sadd.s32 (!%p202_p0), 4294967294, %s369_s22 }
 0x138   : > { %p208_p1 = scmp.gt.s32.totalorder (!%p202_p0), %s370_s21, 0  ;;  %p371_p11 = scmp.lt.s32.totalorder (!%p202_p0), %s370_s21, 8 }
 0x13e   : > { %s846_s21 = smov (!%p208_p1, %s370_s21), 0 }
 0x13f   : > { %s848_s21 = smov (!%p371_p11, %s846_s21), 8 }
 0x140   : > { %s212_s3 = scalar_lea.vmem %s748_s2, %s848_s21 [#allocation2] }
 0x141   : > { %v213_v18 = vld [vmem:[%s212_s3] sm:$0xff]  ;;  %v214_v19 = vld [vmem:[%s212_s3 + $0x10] sm:$0xff] }
 0x142   : > { %217 = vrot.lane.b32.xlu0 %v213_v18, %s602_s4 }
 0x146   : > { %219 = vrot.lane.b32.xlu0 %v214_v19, %s602_s4 }
 0x1b4   : > { %v218_v20 = vpop.permute.xlu0 %217 }
 0x1b5   : > { %v224_v21 = vsel %vm223_vm8, 0.0, %v218_v20 }
 0x1b6   : > { %v227_v22 = vsel %vm226_vm9, %v224_v21, 0.0 }
 0x1b7   : > { %230 = vst.msk [vmem:[%s755_s5] sm:$0xff] %vm229_vm10, %v227_v22 }
 0x1b8   : > { %v220_v23 = vpop.permute.xlu0 %219 }
 0x1b9   : > { %v225_v24 = vsel %vm223_vm8, 0.0, %v220_v23 }
 0x1ba   : > { %v228_v25 = vsel %vm226_vm9, %v225_v24, 0.0 }
 0x1bb   : > { %231 = vst.msk [vmem:[%s755_s5 + $0x8] sm:$0xff] %vm229_vm10, %v228_v25 }
 0x1bc PF: > { %p829_p13 = scmp.ne.s32.totalorder %s826_s28, 0 }
 0x1bd   : > { %s386_s8 = smul.u32 (%p829_p13), 6, %s581_s12 }
 0x1be   : > { %238 = sbr.rel (!%p829_p13) target bundleno = 453 (0x1c5), region = 44  ;;  %v273_v26 = vld [vmem:[%s755_s5] sm:$0xff] (%p829_p13) }
 0x1bf   : > { %s241_s23 = sadd.s32 (%p829_p13), %s577_s11, %s386_s8 }
 0x1c0   : > { %s379_s24 = sshll.u32 (%p829_p13), %s241_s23, 3 }
 0x1c1   : > { %s243_s30 = scalar_lea.vmem (%p829_p13), %s823_s1, %s379_s24 }
 0x1c2   : > { %v275_v27 = vld [vmem:[%s755_s5 + $0x8] sm:$0xff] (%p829_p13)  ;;  %274 = vst [vmem:[%s243_s30] sm:$0xff] (%p829_p13), %v273_v26 }
 0x1c3   : > { %276 = vst [vmem:[%s243_s30 + $0x18] sm:$0xff] (%p829_p13), %v275_v27 }
 0x1c5 PF: > { %s14_s15 = sadd.s32 1, %s593_s15   ;;  %s830_s6 = smov %s561_s7 }
 0x1c6   : > { %p11_p2 = scmp.ge.s32.totalorder %s14_s15, 14   ;;  %s831_s7 = smov %s693_s27 }
 0x1c7   : > { %s832_s8 = smov %s569_s9  ;;  %s833_s9 = smov %s573_s10 }
 0x1c8   : > { %s834_s10 = smov %s690_s26  ;;  %s835_s11 = smov %s585_s13 }
 0x1c9   : > { %s836_s12 = smov %s589_s14  ;;  %s837_s13 = smov %s840_s17 }
 0x1ca   : > { %s838_s14 = smov %s844_s18  ;;  %13 = sbr.rel (!%p11_p2) target bundleno = 6 (0x6), region = 115 }
 0x1d1   :  { %292 = vsyncpa [#allocation3], 1 }
 0x1d2   :  { %294 = vsyncpa [#allocation3 + $0x1], 1 }

</bundles_post_ra>
